<compile_context>
chip_gen: v6e
topology: v6e:2x2x1
jax: 0.10.0
libtpu: 0.0.40
codegen_flags: <defaults>
</compile_context>

<pallas_src>
import jax
import jax.numpy as jnp
from jax.experimental import pallas as pl
from jax.experimental.pallas import tpu as pltpu

_LANES = 128


def _affine_kernel(x_ref, e_ref, t_ref, z_ref):
    # x_ref/z_ref: (TR, C); e_ref/t_ref: (1, C) broadcast over rows.
    z_ref[...] = x_ref[...] * e_ref[...] + t_ref[...]


def affine_constant_flow_forward(x, s, t, *, tile_rows=1024):
    """z = x * exp(s) + t ; log_det = sum(s, axis=1) (shape (1,), as in PyTorch)."""
    N, D = x.shape
    assert s.shape == (1, D) and t.shape == (1, D)
    assert tile_rows % 8 == 0

    # Trivial reduction done outside the kernel (negligible, XLA handles it).
    log_det = jnp.sum(s, axis=1)

    # Precompute exp(s) once (tiny (1,D) op). Do NOT pre-scale x.
    e = jnp.exp(s)

    if D % _LANES == 0:
        # Already lane-dense; just tile the batch axis.
        x_v, e_v, t_v = x, e, t
        rows, cols = N, D
        folded = False
    elif _LANES % D == 0 and (N * D) % _LANES == 0:
        # Fold batch into lanes so every load/store is a full 128-lane access.
        rep = _LANES // D
        rows = (N * D) // _LANES
        cols = _LANES
        x_v = x.reshape(rows, cols)
        e_v = jnp.tile(e, (1, rep))
        t_v = jnp.tile(t, (1, rep))
        folded = True
    else:
        # General fallback: full (ragged) feature dim as the last block dim.
        x_v, e_v, t_v = x, e, t
        rows, cols = N, D
        folded = False

    # Tile the row axis: full extent if small, otherwise tile_rows (mult of 8).
    tr = rows if rows <= tile_rows else tile_rows
    grid = (pl.cdiv(rows, tr),)

    z_v = pl.pallas_call(
        _affine_kernel,
        out_shape=jax.ShapeDtypeStruct((rows, cols), x.dtype),
        grid=grid,
        in_specs=[
            pl.BlockSpec((tr, cols), lambda i: (i, 0)),
            pl.BlockSpec((1, cols), lambda i: (0, 0)),
            pl.BlockSpec((1, cols), lambda i: (0, 0)),
        ],
        out_specs=pl.BlockSpec((tr, cols), lambda i: (i, 0)),
        compiler_params=pltpu.CompilerParams(
            dimension_semantics=("parallel",),
        ),
    )(x_v, e_v, t_v)

    z = z_v.reshape(N, D) if folded else z_v
    return z, log_det


if __name__ == "__main__":
    key = jax.random.PRNGKey(0)
    kx, ks, kt = jax.random.split(key, 3)

    # Small shapes consistent with the module (flow over a 32-dim density).
    N, D = 8, 32
    x = jax.random.normal(kx, (N, D), dtype=jnp.float32)
    s = jax.random.normal(ks, (1, D), dtype=jnp.float32)  # torch.randn(1, dim) analogue
    t = jax.random.normal(kt, (1, D), dtype=jnp.float32)

    z, log_det = affine_constant_flow_forward(x, s, t)
    jax.block_until_ready((z, log_det))

    z_ref = x * jnp.exp(s) + t
    ld_ref = jnp.sum(s, axis=1)
    assert z.shape == (N, D) and log_det.shape == (1,)
    assert jnp.allclose(z, z_ref, atol=1e-5, rtol=1e-5)
    assert jnp.allclose(log_det, ld_ref, atol=1e-5, rtol=1e-5)

    # Exercise the multi-tile pipelined grid path as well (still tiny: ~1 MiB).
    N2 = 8192
    x2 = jax.random.normal(kx, (N2, D), dtype=jnp.float32)
    z2, ld2 = affine_constant_flow_forward(x2, s, t)
    jax.block_until_ready((z2, ld2))
    assert jnp.allclose(z2, x2 * jnp.exp(s) + t, atol=1e-5, rtol=1e-5)
    assert jnp.allclose(ld2, ld_ref, atol=1e-5, rtol=1e-5)

    print("KERNEL_OK")
</pallas_src>

<mosaic_0001>
module attributes {stable_mosaic.version = 11 : i64} {
  func.func @_affine_kernel(%arg0: i32, %arg1: memref<2x128xf32, #tpu.memory_space<vmem>>, %arg2: memref<1x128xf32, #tpu.memory_space<vmem>>, %arg3: memref<1x128xf32, #tpu.memory_space<vmem>>, %arg4: memref<2x128xf32, #tpu.memory_space<vmem>>) attributes {dimension_semantics = [#tpu.dimension_semantics<parallel>], iteration_bounds = array<i64: 1>, scalar_prefetch = 0 : i64, scratch_operands = 0 : i64, tpu.core_type = #tpu.core_type<tc>, window_params = [{transform_indices = @transform_0, window_bounds = array<i64: 2, 128>}, {pipeline_mode = #tpu.pipeline_mode<synchronous>, transform_indices = @transform_1, window_bounds = array<i64: 1, 128>}, {pipeline_mode = #tpu.pipeline_mode<synchronous>, transform_indices = @transform_2, window_bounds = array<i64: 1, 128>}, {transform_indices = @transform_3, window_bounds = array<i64: 2, 128>}]} {
    %c0 = arith.constant 0 : index
    %c0_0 = arith.constant 0 : index
    %0 = vector.load %arg1[%c0, %c0_0] : memref<2x128xf32, #tpu.memory_space<vmem>>, vector<2x128xf32>
    %c0_1 = arith.constant 0 : index
    %c0_2 = arith.constant 0 : index
    %1 = vector.load %arg2[%c0_1, %c0_2] : memref<1x128xf32, #tpu.memory_space<vmem>>, vector<1x128xf32>
    %2 = vector.broadcast %1 : vector<1x128xf32> to vector<2x128xf32>
    %3 = arith.mulf %0, %2 : vector<2x128xf32>
    %c0_3 = arith.constant 0 : index
    %c0_4 = arith.constant 0 : index
    %4 = vector.load %arg3[%c0_3, %c0_4] : memref<1x128xf32, #tpu.memory_space<vmem>>, vector<1x128xf32>
    %5 = vector.broadcast %4 : vector<1x128xf32> to vector<2x128xf32>
    %6 = arith.addf %3, %5 : vector<2x128xf32>
    %c0_5 = arith.constant 0 : index
    %c0_6 = arith.constant 0 : index
    %7 = vector.load %arg4[%c0_5, %c0_6] : memref<2x128xf32, #tpu.memory_space<vmem>>, vector<2x128xf32>
    tpu.vector_store %arg4[%c0_5, %c0_6], %6 {strides = array<i32>} : memref<2x128xf32, #tpu.memory_space<vmem>>, vector<2x128xf32>,
    return
  }
  func.func @transform_0(%arg0: i32) -> (i32, i32) {
    %c0_i32 = arith.constant 0 : i32
    %c0_i32_0 = arith.constant 0 : i32
    return %arg0, %c0_i32 : i32, i32
  }
  func.func @transform_1(%arg0: i32) -> (i32, i32) {
    %c0_i32 = arith.constant 0 : i32
    %c0_i32_0 = arith.constant 0 : i32
    %c0_i32_1 = arith.constant 0 : i32
    return %c0_i32, %c0_i32_0 : i32, i32
  }
  func.func @transform_2(%arg0: i32) -> (i32, i32) {
    %c0_i32 = arith.constant 0 : i32
    %c0_i32_0 = arith.constant 0 : i32
    %c0_i32_1 = arith.constant 0 : i32
    return %c0_i32, %c0_i32_0 : i32, i32
  }
  func.func @transform_3(%arg0: i32) -> (i32, i32) {
    %c0_i32 = arith.constant 0 : i32
    %c0_i32_0 = arith.constant 0 : i32
    return %arg0, %c0_i32 : i32, i32
  }
}

</mosaic_0001>

<bundles_post_ra>
// kernel: tpu_custom_call.1
= control target key start
LH: loop header
LB: loop body
LE: loop exit
PB: predicated region body
PF: predicated region fallthrough
CT: control target
= control target key end

     0   :  { %8 = vsyncpa [#allocation3], 0  ;;  %s142_s0 = inlined_call_operand.hbm [shape: f32[2,128], index: 0, kind: input, shape index: {}]   ;;  %s143_s1 = inlined_call_operand.vmem [shape: f32[1,128], index: 1, kind: input, shape index: {}]   ;;  %s144_s2 = inlined_call_operand.vmem [shape: f32[1,128], index: 2, kind: input, shape index: {}]   ;;  %s145_s3 = inlined_call_operand.hbm [shape: f32[2,128], index: 3, kind: output, shape index: {}]  }
   0x1   :  { %9 = vsyncpa [#allocation4], 0  ;;  %s108_s12 = smov [#allocation2]  }
   0x2   :  { %s16_s13 = sshll.u32 %s108_s12, 4  ;;  %s17_s13 = int_to_ptr.vmem [resolvable:$true] %s16_s13 }
   0x3   :  { %s72_s14 = scalar_lea.vmem %s17_s13, 32  ;;  %p77_p1 = scmp.lt.s32.totalorder %s17_s13, %s17_s13 }
   0x4   :  { %p73_p0 = scmp.ne.s32.totalorder %s17_s13, %s72_s14  ;;  %p78_p2 = scmp.lt.s32.totalorder %s72_s14, %s72_s14 }
   0x6   :  { %p79_p3 = por %p78_p2, %p77_p1 }
   0x8   :  { %p80_p4 = pnand %p79_p3, %p73_p0 }
   0xa   :  { %83 = shalt.err (!%p80_p4)
}
   0xb   :  { %19 = dma.hbm_to_vmem [thread:$0]  %s142_s0, 32, %s17_s13, [#allocation3]  }
   0xc   :  { %104 = dma.done.wait [#allocation3], 32  }
   0xd   :  { %105 = vsyncadd [#allocation3], 4294967264  ;;  %s109_s17 = smov [#allocation5]   ;;  %v27_v0 = vld [vmem:[#allocation2] sm:$0x3] }
   0xe   :  { %s51_s18 = sshll.u32 %s109_s17, 4  ;;  %v60_v1 = vld [vmem:[%s143_s1] ss:$0 sm:$0xff]  ;;  %s52_s18 = int_to_ptr.vmem [resolvable:$true] %s51_s18 }
   0xf   :  { %v61_v2 = vld [vmem:[%s144_s2] ss:$0 sm:$0xff]  ;;  %v35_v3 = vmul.f32 %v60_v1, %v27_v0  ;;  %s84_s23 = scalar_lea.vmem %s52_s18, 32  ;;  %p89_p6 = scmp.lt.s32.totalorder %s52_s18, %s52_s18 }
  0x10   :  { %p85_p5 = scmp.ne.s32.totalorder %s52_s18, %s84_s23  ;;  %p90_p7 = scmp.lt.s32.totalorder %s84_s23, %s84_s23 }
  0x11   :  { %v43_v4 = vadd.f32 %v61_v2, %v35_v3 }
  0x12   :  { %p91_p8 = por %p90_p7, %p89_p6 }
  0x13   :  { %44 = vst [vmem:[#allocation5] sm:$0x3] %v43_v4 }
  0x14   :  { %p92_p9 = pnand %p91_p8, %p85_p5 }
  0x16   :  { %95 = shalt.err (!%p92_p9)
}
  0x17   :  { %54 = dma.vmem_to_hbm [thread:$0]  %s52_s18, 32, %s145_s3, [#allocation4]  }
  0x18   :  { %106 = dma.done.wait [#allocation4], 32  }
  0x19   :  { %107 = vsyncadd [#allocation4], 4294967264 }
  0x1a   :  { %58 = vsyncpa [#allocation3], 1 }
  0x1b   :  { %59 = vsyncpa [#allocation4], 1 }

</bundles_post_ra>
